<compile_context>
chip_gen: v6e
topology: v6e:2x2x1
jax: 0.10.0
libtpu: 0.0.40
codegen_flags: <defaults>
</compile_context>

<pallas_src>
import jax
import jax.numpy as jnp
from jax.experimental import pallas as pl
from jax.experimental.pallas import tpu as pltpu


def _camera_kernel(b_ref, pr_ref, pg_ref, pb_ref, mr_ref, mg_ref, mb_ref,
                   sr_ref, sg_ref, sb_ref):
    # b_ref          : (bn, K)   coefficient rows
    # p{r,g,b}_ref   : (K, C)    per-channel slices of PC^T (constant blocks)
    # m{r,g,b}_ref   : (1, C)    per-channel slices of mu   (constant blocks)
    # s{r,g,b}_ref   : (bn, C)   per-channel outputs (written directly)
    b = b_ref[...]
    sr_ref[...] = jnp.maximum(
        jnp.dot(b, pr_ref[...], preferred_element_type=jnp.float32) + mr_ref[...], 0.0
    ).astype(sr_ref.dtype)
    sg_ref[...] = jnp.maximum(
        jnp.dot(b, pg_ref[...], preferred_element_type=jnp.float32) + mg_ref[...], 0.0
    ).astype(sg_ref.dtype)
    sb_ref[...] = jnp.maximum(
        jnp.dot(b, pb_ref[...], preferred_element_type=jnp.float32) + mb_ref[...], 0.0
    ).astype(sb_ref.dtype)


def camera_model(mu, PC, b, *, block_n: int = 1024):
    """mu: (D,) or (1, D); PC: (D, K); b: (N, K); D == 99 (3 channels x 33 bands).

    Returns (Sr, Sg, Sb), each (N, 33), matching the PyTorch forward.
    """
    PC = jnp.asarray(PC, jnp.float32)
    b = jnp.asarray(b, jnp.float32)
    D, K = PC.shape
    N = b.shape[0]
    assert b.shape[1] == K
    assert D % 3 == 0, "spectral dim must split into 3 equal channels"
    C = D // 3  # 33 in the reference model

    mu2 = jnp.asarray(mu, jnp.float32).reshape(1, D)
    pct = PC.T  # (K, D)

    # Pre-split constants per channel (tiny, done once by XLA at trace time).
    pr, pg, pb_ = pct[:, 0:C], pct[:, C:2 * C], pct[:, 2 * C:3 * C]
    mr, mg, mb_ = mu2[:, 0:C], mu2[:, C:2 * C], mu2[:, 2 * C:3 * C]

    # Row tile: multiple of 8 (sublanes) when tiling, or the full array dim.
    if N <= block_n:
        bn = N
    else:
        bn = (block_n // 8) * 8
        bn = max(bn, 8)
    grid = (pl.cdiv(N, bn),)

    row_spec = lambda i: (i, 0)
    const_spec = lambda i: (0, 0)

    out_shape = (
        jax.ShapeDtypeStruct((N, C), jnp.float32),
        jax.ShapeDtypeStruct((N, C), jnp.float32),
        jax.ShapeDtypeStruct((N, C), jnp.float32),
    )

    Sr, Sg, Sb = pl.pallas_call(
        _camera_kernel,
        out_shape=out_shape,
        grid=grid,
        in_specs=[
            pl.BlockSpec((bn, K), row_spec),     # b rows, tiled over the grid
            pl.BlockSpec((K, C), const_spec),    # PC^T channel R (constant)
            pl.BlockSpec((K, C), const_spec),    # PC^T channel G (constant)
            pl.BlockSpec((K, C), const_spec),    # PC^T channel B (constant)
            pl.BlockSpec((1, C), const_spec),    # mu channel R (constant)
            pl.BlockSpec((1, C), const_spec),    # mu channel G (constant)
            pl.BlockSpec((1, C), const_spec),    # mu channel B (constant)
        ],
        out_specs=(
            pl.BlockSpec((bn, C), row_spec),
            pl.BlockSpec((bn, C), row_spec),
            pl.BlockSpec((bn, C), row_spec),
        ),
        compiler_params=pltpu.CompilerParams(
            dimension_semantics=("parallel",),
            vmem_limit_bytes=32 * 1024 * 1024,
        ),
        cost_estimate=pl.CostEstimate(
            flops=2 * N * K * D + 2 * N * D,
            transcendentals=0,
            bytes_accessed=4 * (N * K + K * D + D + N * D),
        ),
    )(b, pr, pg, pb_, mr, mg, mb_)

    return Sr, Sg, Sb


def _reference(mu, PC, b):
    S = jnp.maximum(
        jnp.dot(PC, b.T, precision=jax.lax.Precision.HIGHEST).T + mu.reshape(1, -1),
        0.0,
    )
    C = PC.shape[0] // 3
    return S[:, :C], S[:, C:2 * C], S[:, 2 * C:3 * C]


if __name__ == "__main__":
    key = jax.random.PRNGKey(0)
    k1, k2, k3, k4 = jax.random.split(key, 4)

    # Small shapes consistent with the module: D = 99 spectral dim, K PCs, N samples.
    D, K, N = 99, 8, 8
    mu = jax.random.normal(k1, (D,), dtype=jnp.float32)
    PC = jax.random.normal(k2, (D, K), dtype=jnp.float32)
    b = jax.random.normal(k3, (N, K), dtype=jnp.float32)

    Sr, Sg, Sb = jax.block_until_ready(camera_model(mu, PC, b))
    Rr, Rg, Rb = _reference(mu, PC, b)
    assert Sr.shape == (N, 33) and Sg.shape == (N, 33) and Sb.shape == (N, 33)
    assert jnp.allclose(Sr, Rr, rtol=1e-5, atol=1e-5)
    assert jnp.allclose(Sg, Rg, rtol=1e-5, atol=1e-5)
    assert jnp.allclose(Sb, Rb, rtol=1e-5, atol=1e-5)

    # Second small check: multi-step grid with a partial last block
    # (N not a multiple of the row tile), exercising Pallas edge masking.
    N2 = 40
    b2 = jax.random.normal(k4, (N2, K), dtype=jnp.float32)
    Sr2, Sg2, Sb2 = jax.block_until_ready(camera_model(mu, PC, b2, block_n=16))
    Rr2, Rg2, Rb2 = _reference(mu, PC, b2)
    assert Sr2.shape == (N2, 33)
    assert jnp.allclose(Sr2, Rr2, rtol=1e-5, atol=1e-5)
    assert jnp.allclose(Sg2, Rg2, rtol=1e-5, atol=1e-5)
    assert jnp.allclose(Sb2, Rb2, rtol=1e-5, atol=1e-5)

    print("KERNEL_OK")
</pallas_src>

<mosaic_0001>
module attributes {stable_mosaic.version = 11 : i64} {
  func.func @_camera_kernel(%arg0: i32, %arg1: memref<8x8xf32, #tpu.memory_space<vmem>>, %arg2: memref<8x33xf32, #tpu.memory_space<vmem>>, %arg3: memref<8x33xf32, #tpu.memory_space<vmem>>, %arg4: memref<8x33xf32, #tpu.memory_space<vmem>>, %arg5: memref<1x33xf32, #tpu.memory_space<vmem>>, %arg6: memref<1x33xf32, #tpu.memory_space<vmem>>, %arg7: memref<1x33xf32, #tpu.memory_space<vmem>>, %arg8: memref<8x33xf32, #tpu.memory_space<vmem>>, %arg9: memref<8x33xf32, #tpu.memory_space<vmem>>, %arg10: memref<8x33xf32, #tpu.memory_space<vmem>>) attributes {dimension_semantics = [#tpu.dimension_semantics<parallel>], iteration_bounds = array<i64: 1>, scalar_prefetch = 0 : i64, scratch_operands = 0 : i64, tpu.core_type = #tpu.core_type<tc>, window_params = [{transform_indices = @transform_0, window_bounds = array<i64: 8, 8>}, {pipeline_mode = #tpu.pipeline_mode<synchronous>, transform_indices = @transform_1, window_bounds = array<i64: 8, 33>}, {pipeline_mode = #tpu.pipeline_mode<synchronous>, transform_indices = @transform_2, window_bounds = array<i64: 8, 33>}, {pipeline_mode = #tpu.pipeline_mode<synchronous>, transform_indices = @transform_3, window_bounds = array<i64: 8, 33>}, {pipeline_mode = #tpu.pipeline_mode<synchronous>, transform_indices = @transform_4, window_bounds = array<i64: 1, 33>}, {pipeline_mode = #tpu.pipeline_mode<synchronous>, transform_indices = @transform_5, window_bounds = array<i64: 1, 33>}, {pipeline_mode = #tpu.pipeline_mode<synchronous>, transform_indices = @transform_6, window_bounds = array<i64: 1, 33>}, {transform_indices = @transform_7, window_bounds = array<i64: 8, 33>}, {transform_indices = @transform_8, window_bounds = array<i64: 8, 33>}, {transform_indices = @transform_9, window_bounds = array<i64: 8, 33>}]} {
    %c0 = arith.constant 0 : index
    %c0_0 = arith.constant 0 : index
    %0 = vector.load %arg1[%c0, %c0_0] : memref<8x8xf32, #tpu.memory_space<vmem>>, vector<8x8xf32>
    %c0_1 = arith.constant 0 : index
    %c0_2 = arith.constant 0 : index
    %1 = vector.load %arg2[%c0_1, %c0_2] : memref<8x33xf32, #tpu.memory_space<vmem>>, vector<8x33xf32>
    %cst = arith.constant dense<0.000000e+00> : vector<8x33xf32>
    %2 = tpu.matmul %0, %1, %cst {dimension_numbers = #tpu.dot_dimension_numbers<[1], [0], [0], [1], [0, 0, 1, 1], [], []>} : vector<8x8xf32>, vector<8x33xf32>, vector<8x33xf32> -> vector<8x33xf32>
    %c0_3 = arith.constant 0 : index
    %c0_4 = arith.constant 0 : index
    %3 = vector.load %arg5[%c0_3, %c0_4] : memref<1x33xf32, #tpu.memory_space<vmem>>, vector<1x33xf32>
    %4 = vector.broadcast %3 : vector<1x33xf32> to vector<8x33xf32>
    %5 = arith.addf %2, %4 : vector<8x33xf32>
    %cst_5 = arith.constant 0.000000e+00 : f32
    %6 = vector.broadcast %cst_5 : f32 to vector<8x33xf32>
    %7 = arith.maximumf %5, %6 : vector<8x33xf32>
    %c0_6 = arith.constant 0 : index
    %c0_7 = arith.constant 0 : index
    %8 = vector.load %arg8[%c0_6, %c0_7] : memref<8x33xf32, #tpu.memory_space<vmem>>, vector<8x33xf32>
    tpu.vector_store %arg8[%c0_6, %c0_7], %7 {strides = array<i32>} : memref<8x33xf32, #tpu.memory_space<vmem>>, vector<8x33xf32>,
    %c0_8 = arith.constant 0 : index
    %c0_9 = arith.constant 0 : index
    %9 = vector.load %arg3[%c0_8, %c0_9] : memref<8x33xf32, #tpu.memory_space<vmem>>, vector<8x33xf32>
    %cst_10 = arith.constant dense<0.000000e+00> : vector<8x33xf32>
    %10 = tpu.matmul %0, %9, %cst_10 {dimension_numbers = #tpu.dot_dimension_numbers<[1], [0], [0], [1], [0, 0, 1, 1], [], []>} : vector<8x8xf32>, vector<8x33xf32>, vector<8x33xf32> -> vector<8x33xf32>
    %c0_11 = arith.constant 0 : index
    %c0_12 = arith.constant 0 : index
    %11 = vector.load %arg6[%c0_11, %c0_12] : memref<1x33xf32, #tpu.memory_space<vmem>>, vector<1x33xf32>
    %12 = vector.broadcast %11 : vector<1x33xf32> to vector<8x33xf32>
    %13 = arith.addf %10, %12 : vector<8x33xf32>
    %cst_13 = arith.constant 0.000000e+00 : f32
    %14 = vector.broadcast %cst_13 : f32 to vector<8x33xf32>
    %15 = arith.maximumf %13, %14 : vector<8x33xf32>
    %c0_14 = arith.constant 0 : index
    %c0_15 = arith.constant 0 : index
    %16 = vector.load %arg9[%c0_14, %c0_15] : memref<8x33xf32, #tpu.memory_space<vmem>>, vector<8x33xf32>
    tpu.vector_store %arg9[%c0_14, %c0_15], %15 {strides = array<i32>} : memref<8x33xf32, #tpu.memory_space<vmem>>, vector<8x33xf32>,
    %c0_16 = arith.constant 0 : index
    %c0_17 = arith.constant 0 : index
    %17 = vector.load %arg4[%c0_16, %c0_17] : memref<8x33xf32, #tpu.memory_space<vmem>>, vector<8x33xf32>
    %cst_18 = arith.constant dense<0.000000e+00> : vector<8x33xf32>
    %18 = tpu.matmul %0, %17, %cst_18 {dimension_numbers = #tpu.dot_dimension_numbers<[1], [0], [0], [1], [0, 0, 1, 1], [], []>} : vector<8x8xf32>, vector<8x33xf32>, vector<8x33xf32> -> vector<8x33xf32>
    %c0_19 = arith.constant 0 : index
    %c0_20 = arith.constant 0 : index
    %19 = vector.load %arg7[%c0_19, %c0_20] : memref<1x33xf32, #tpu.memory_space<vmem>>, vector<1x33xf32>
    %20 = vector.broadcast %19 : vector<1x33xf32> to vector<8x33xf32>
    %21 = arith.addf %18, %20 : vector<8x33xf32>
    %cst_21 = arith.constant 0.000000e+00 : f32
    %22 = vector.broadcast %cst_21 : f32 to vector<8x33xf32>
    %23 = arith.maximumf %21, %22 : vector<8x33xf32>
    %c0_22 = arith.constant 0 : index
    %c0_23 = arith.constant 0 : index
    %24 = vector.load %arg10[%c0_22, %c0_23] : memref<8x33xf32, #tpu.memory_space<vmem>>, vector<8x33xf32>
    tpu.vector_store %arg10[%c0_22, %c0_23], %23 {strides = array<i32>} : memref<8x33xf32, #tpu.memory_space<vmem>>, vector<8x33xf32>,
    return
  }
  func.func @transform_0(%arg0: i32) -> (i32, i32) {
    %c0_i32 = arith.constant 0 : i32
    %c0_i32_0 = arith.constant 0 : i32
    return %arg0, %c0_i32 : i32, i32
  }
  func.func @transform_1(%arg0: i32) -> (i32, i32) {
    %c0_i32 = arith.constant 0 : i32
    %c0_i32_0 = arith.constant 0 : i32
    %c0_i32_1 = arith.constant 0 : i32
    return %c0_i32, %c0_i32_0 : i32, i32
  }
  func.func @transform_2(%arg0: i32) -> (i32, i32) {
    %c0_i32 = arith.constant 0 : i32
    %c0_i32_0 = arith.constant 0 : i32
    %c0_i32_1 = arith.constant 0 : i32
    return %c0_i32, %c0_i32_0 : i32, i32
  }
  func.func @transform_3(%arg0: i32) -> (i32, i32) {
    %c0_i32 = arith.constant 0 : i32
    %c0_i32_0 = arith.constant 0 : i32
    %c0_i32_1 = arith.constant 0 : i32
    return %c0_i32, %c0_i32_0 : i32, i32
  }
  func.func @transform_4(%arg0: i32) -> (i32, i32) {
    %c0_i32 = arith.constant 0 : i32
    %c0_i32_0 = arith.constant 0 : i32
    %c0_i32_1 = arith.constant 0 : i32
    return %c0_i32, %c0_i32_0 : i32, i32
  }
  func.func @transform_5(%arg0: i32) -> (i32, i32) {
    %c0_i32 = arith.constant 0 : i32
    %c0_i32_0 = arith.constant 0 : i32
    %c0_i32_1 = arith.constant 0 : i32
    return %c0_i32, %c0_i32_0 : i32, i32
  }
  func.func @transform_6(%arg0: i32) -> (i32, i32) {
    %c0_i32 = arith.constant 0 : i32
    %c0_i32_0 = arith.constant 0 : i32
    %c0_i32_1 = arith.constant 0 : i32
    return %c0_i32, %c0_i32_0 : i32, i32
  }
  func.func @transform_7(%arg0: i32) -> (i32, i32) {
    %c0_i32 = arith.constant 0 : i32
    %c0_i32_0 = arith.constant 0 : i32
    return %arg0, %c0_i32 : i32, i32
  }
  func.func @transform_8(%arg0: i32) -> (i32, i32) {
    %c0_i32 = arith.constant 0 : i32
    %c0_i32_0 = arith.constant 0 : i32
    return %arg0, %c0_i32 : i32, i32
  }
  func.func @transform_9(%arg0: i32) -> (i32, i32) {
    %c0_i32 = arith.constant 0 : i32
    %c0_i32_0 = arith.constant 0 : i32
    return %arg0, %c0_i32 : i32, i32
  }
}

</mosaic_0001>

<bundles_post_ra>
// kernel: tpu_custom_call.1
= control target key start
LH: loop header
LB: loop body
LE: loop exit
PB: predicated region body
PF: predicated region fallthrough
CT: control target
= control target key end

     0   :  { %15 = vsyncpa [#allocation3], 0  ;;  %s646_s0 = inlined_call_operand.hbm [shape: f32[8,8], index: 0, kind: input, shape index: {}]   ;;  %s647_s1 = inlined_call_operand.hbm [shape: f32[8,33], index: 1, kind: input, shape index: {}]   ;;  %s648_s2 = inlined_call_operand.hbm [shape: f32[8,33], index: 2, kind: input, shape index: {}]   ;;  %s649_s3 = inlined_call_operand.hbm [shape: f32[8,33], index: 3, kind: input, shape index: {}]   ;;  %s650_s4 = inlined_call_operand.vmem [shape: f32[1,33], index: 4, kind: input, shape index: {}]   ;;  %s651_s5 = inlined_call_operand.vmem [shape: f32[1,33], index: 5, kind: input, shape index: {}]   ;;  %s652_s6 = inlined_call_operand.vmem [shape: f32[1,33], index: 6, kind: input, shape index: {}]   ;;  %s653_s7 = inlined_call_operand.hbm [shape: f32[8,33], index: 7, kind: output, shape index: {0}]   ;;  %s654_s8 = inlined_call_operand.hbm [shape: f32[8,33], index: 8, kind: output, shape index: {1}]   ;;  %s655_s9 = inlined_call_operand.hbm [shape: f32[8,33], index: 9, kind: output, shape index: {2}]  }
   0x1   :  { %16 = vsyncpa [#allocation6], 0 }
   0x2   :  { %17 = vsyncpa [#allocation9], 0 }
   0x3   :  { %18 = vsyncpa [#allocation4], 0 }
   0x4   :  { %19 = vsyncpa [#allocation12], 0  ;;  %s554_s30 = smov [#allocation5]   ;;  %s555_s11 = smov [#allocation2]  }
   0x5   :  { %s36_s10 = sshll.u32 %s554_s30, 4  ;;  %s26_s12 = sshll.u32 %s555_s11, 4  ;;  %s37_s10 = int_to_ptr.vmem [resolvable:$true] %s36_s10  ;;  %s27_s12 = int_to_ptr.vmem [resolvable:$true] %s26_s12 }
   0x6   :  { %s412_s13 = scalar_lea.vmem %s37_s10, 128  ;;  %p417_p1 = scmp.lt.s32.totalorder %s37_s10, %s37_s10 }
   0x7   :  { %p413_p0 = scmp.ne.s32.totalorder %s37_s10, %s412_s13  ;;  %p418_p2 = scmp.lt.s32.totalorder %s412_s13, %s412_s13 }
   0x9   :  { %p419_p3 = por %p418_p2, %p417_p1 }
   0xb   :  { %p420_p4 = pnand %p419_p3, %p413_p0 }
   0xd   :  { %423 = shalt.err (!%p420_p4)
}
   0xe   :  { %39 = dma.hbm_to_vmem [thread:$0]  %s647_s1, 128, %s37_s10, [#allocation6]  }
   0xf   :  { %s432_s16 = scalar_lea.vmem %s27_s12, 128  ;;  %p437_p6 = scmp.lt.s32.totalorder %s27_s12, %s27_s12 }
  0x10   :  { %p433_p5 = scmp.ne.s32.totalorder %s27_s12, %s432_s16  ;;  %p438_p7 = scmp.lt.s32.totalorder %s432_s16, %s432_s16 }
  0x12   :  { %p439_p8 = por %p438_p7, %p437_p6 }
  0x14   :  { %p440_p9 = pnand %p439_p8, %p433_p5 }
  0x16   :  { %443 = shalt.err (!%p440_p9)
}
  0x17   :  { %29 = dma.hbm_to_vmem [thread:$0]  %s646_s0, 128, %s27_s12, [#allocation3]  }
  0x18   :  { %s556_s19 = smov [#allocation7]   ;;  %s557_s21 = smov [#allocation8]  }
  0x19   :  { %s46_s20 = sshll.u32 %s556_s19, 4  ;;  %s56_s22 = sshll.u32 %s557_s21, 4  ;;  %s47_s20 = int_to_ptr.vmem [resolvable:$true] %s46_s20  ;;  %s57_s22 = int_to_ptr.vmem [resolvable:$true] %s56_s22 }
  0x1a   :  { %s452_s23 = scalar_lea.vmem %s47_s20, 128  ;;  %p457_p11 = scmp.lt.s32.totalorder %s47_s20, %s47_s20 }
  0x1b   :  { %p453_p10 = scmp.ne.s32.totalorder %s47_s20, %s452_s23  ;;  %p458_p12 = scmp.lt.s32.totalorder %s452_s23, %s452_s23 }
  0x1d   :  { %p459_p13 = por %p458_p12, %p457_p11 }
  0x1f   :  { %p460_p0 = pnand %p459_p13, %p453_p10 }
  0x21   :  { %463 = shalt.err (!%p460_p0)
}
  0x22   :  { %49 = dma.hbm_to_vmem [thread:$0]  %s648_s2, 128, %s47_s20, [#allocation6]  }
  0x23   :  { %s472_s25 = scalar_lea.vmem %s57_s22, 128  ;;  %p477_p2 = scmp.lt.s32.totalorder %s57_s22, %s57_s22 }
  0x24   :  { %p473_p1 = scmp.ne.s32.totalorder %s57_s22, %s472_s25  ;;  %p478_p3 = scmp.lt.s32.totalorder %s472_s25, %s472_s25 }
  0x26   :  { %p479_p4 = por %p478_p3, %p477_p2 }
  0x28   :  { %p480_p5 = pnand %p479_p4, %p473_p1 }
  0x2a   :  { %483 = shalt.err (!%p480_p5)
}
  0x2b   :  { %59 = dma.hbm_to_vmem [thread:$0]  %s649_s3, 128, %s57_s22, [#allocation9]  }
  0x2c   :  { %544 = dma.done.wait [#allocation3], 128  }
  0x2d   :  { %545 = vsyncadd [#allocation3], 4294967168 }
  0x2e   :  { %546 = dma.done.wait [#allocation6], 256  }
  0x2f   :  { %547 = vsyncadd [#allocation6], 4294967040 }
  0x30   :  { %548 = dma.done.wait [#allocation9], 128  }
  0x31   :  { %549 = vsyncadd [#allocation9], 4294967168  ;;  %v558_v0 = vmov 0.0   ;;  %vm559_vm0 = vmmov 0   ;;  %vm87_vm1 = vcmask 64512   ;;  %v79_v1 = vld [vmem:[#allocation5] sm:$0xff] }
  0x32   :  { %380 = vmatprep.subr.mxu0 %v558_v0  ;;  %382 = vmatprep.mubr.msk.f32.mxu0 %vm559_vm0, %v558_v0  ;;  %v78_v2 = vld [vmem:[#allocation2] sm:$0xff]  ;;  %v164_v3 = vld [vmem:[#allocation7] sm:$0xff]  ;;  %v244_v4 = vld [vmem:[#allocation8] sm:$0xff]  ;;  %s560_s29 = smov [#allocation10]   ;;  %s561_s10 = smov [#allocation11]   ;;  %vm162_vm2 = vcmask 269312  }
  0x33   :  { %385 = vmatprep.subr.mxu1 %v558_v0  ;;  %387 = vmatprep.mubr.msk.f32.mxu1 %vm559_vm0, %v558_v0  ;;  %v368_v5 = vld [vmem:[%s650_s4] ss:$0 sm:$0xff]  ;;  %s330_s30 = sshll.u32 %s560_s29, 4  ;;  %s340_s11 = sshll.u32 %s561_s10, 4  ;;  %s331_s30 = int_to_ptr.vmem [resolvable:$true] %s330_s30  ;;  %s341_s11 = int_to_ptr.vmem [resolvable:$true] %s340_s11 }
  0x34   :  { %381 = vmatpush3.msra.mxu0 %v79_v1  ;;  %386 = vmatpush3.msra.mxu1 %v164_v3  ;;  %v370_v6 = vld [vmem:[%s651_s5] ss:$0 sm:$0xff]  ;;  %s562_s14 = smov [#allocation13]   ;;  %s484_s5 = scalar_lea.vmem %s331_s30, 128 }
  0x35   :  { %383 = vmatmul.mubr.msk.f32.vlgmr.msra.gmra.mxu0 %vm87_vm1, %v78_v2  ;;  %390 = vmatprep.subr.mxu0 %v558_v0  ;;  %v372_v12 = vld [vmem:[%s652_s6] ss:$0 sm:$0xff]  ;;  %s350_s4 = sshll.u32 %s562_s14, 4  ;;  %p485_p6 = scmp.ne.s32.totalorder %s331_s30, %s484_s5  ;;  %s351_s4 = int_to_ptr.vmem [resolvable:$true] %s350_s4 }
  0x36   :  { %391 = vmatpush3.msra.mxu0 %v244_v4  ;;  %388 = vmatmul.mubr.msk.f32.vlgmr.msra.gmra.mxu1 %vm87_vm1, %v78_v2  ;;  %p489_p7 = scmp.lt.s32.totalorder %s331_s30, %s331_s30  ;;  %p490_p8 = scmp.lt.s32.totalorder %s484_s5, %s484_s5 }
  0x37   :  { %392 = vmatprep.mubr.msk.f32.mxu0 %vm559_vm0, %v558_v0 }
  0x38   :  { %p491_p9 = por %p490_p8, %p489_p7 }
  0x39   :  { %393 = vmatmul.mubr.msk.f32.vlgmr.msra.gmra.mxu0 %vm87_vm1, %v78_v2 }
  0x3a   :  { %p492_p10 = pnand %p491_p9, %p485_p6 }
  0xf5   :  { %v157_v7 = vpop.f32.mrf.mxu0 }
  0xf6   :  { %v158_v8 = vadd.f32 %v368_v5, %v157_v7  ;;  %v238_v9 = vpop.f32.mrf.mxu1 }
  0xf7   :  { %v384_v10 = vpop.f32.mrf.mxu0  ;;  %v239_v11 = vadd.f32 %v370_v6, %v238_v9 }
  0xf8   :  { %v161_v13 = vmax.f32 %v158_v8, 0.0  ;;  %v389_v14 = vpop.f32.mrf.mxu1 }
  0xf9   :  { %v242_v15 = vmax.f32 %v239_v11, 0.0  ;;  %v318_v16 = vpop.f32.mrf.mxu0 }
  0xfa   :  { %v319_v17 = vadd.f32 %v372_v12, %v318_v16  ;;  %163 = vst.msk [vmem:[#allocation10] sm:$0xff] %vm162_vm2, %v161_v13 }
  0xfb   :  { %v394_v18 = vpop.f32.mrf.mxu0  ;;  %243 = vst.msk [vmem:[#allocation11] sm:$0xff] %vm162_vm2, %v242_v15 }
  0xfc   :  { %495 = shalt.err (!%p492_p10)
}
  0xfd   :  { %333 = dma.vmem_to_hbm [thread:$0]  %s331_s30, 128, %s653_s7, [#allocation4]   ;;  %v322_v19 = vmax.f32 %v319_v17, 0.0 }
  0xfe   :  { %s504_s16 = scalar_lea.vmem %s341_s11, 128  ;;  %p509_p12 = scmp.lt.s32.totalorder %s341_s11, %s341_s11 }
  0xff   :  { %p505_p11 = scmp.ne.s32.totalorder %s341_s11, %s504_s16  ;;  %p510_p13 = scmp.lt.s32.totalorder %s504_s16, %s504_s16 }
 0x101   :  { %p511_p0 = por %p510_p13, %p509_p12 }
 0x103   :  { %p512_p1 = pnand %p511_p0, %p505_p11 }
 0x105   :  { %515 = shalt.err (!%p512_p1)
}
 0x106   :  { %343 = dma.vmem_to_hbm [thread:$0]  %s341_s11, 128, %s654_s8, [#allocation12]   ;;  %323 = vst.msk [vmem:[#allocation13] sm:$0xff] %vm162_vm2, %v322_v19 }
 0x107   :  { %s524_s19 = scalar_lea.vmem %s351_s4, 128  ;;  %p529_p3 = scmp.lt.s32.totalorder %s351_s4, %s351_s4 }
 0x108   :  { %p525_p2 = scmp.ne.s32.totalorder %s351_s4, %s524_s19  ;;  %p530_p4 = scmp.lt.s32.totalorder %s524_s19, %s524_s19 }
 0x10a   :  { %p531_p5 = por %p530_p4, %p529_p3 }
 0x10c   :  { %p532_p6 = pnand %p531_p5, %p525_p2 }
 0x10e   :  { %535 = shalt.err (!%p532_p6)
}
 0x10f   :  { %353 = dma.vmem_to_hbm [thread:$0]  %s351_s4, 128, %s655_s9, [#allocation12]  }
 0x110   :  { %550 = dma.done.wait [#allocation4], 128  }
 0x111   :  { %551 = vsyncadd [#allocation4], 4294967168 }
 0x112   :  { %552 = dma.done.wait [#allocation12], 256  }
 0x113   :  { %553 = vsyncadd [#allocation12], 4294967040 }
 0x114   :  { %363 = vsyncpa [#allocation3], 1 }
 0x115   :  { %364 = vsyncpa [#allocation6], 1 }
 0x116   :  { %365 = vsyncpa [#allocation9], 1 }
 0x117   :  { %366 = vsyncpa [#allocation4], 1 }
 0x118   :  { %367 = vsyncpa [#allocation12], 1 }

</bundles_post_ra>
